<compile_context>
chip_gen: v7x
topology: tpu7x:2x2x1
jax: 0.10.0
libtpu: 0.0.40
codegen_flags: <defaults>
</compile_context>

<pallas_src>
import jax
import jax.numpy as jnp
from jax.experimental import pallas as pl
from jax.experimental.pallas import tpu as pltpu

X_DIM = 768 * 2   # 1536
H_DIM = 50
O_DIM = 2

H_PAD = 128       # hidden dim zero-padded to one full lane width (exact)
O_SUB = 8         # output dim zero-padded to one sublane group (transposed layout)


def _round_up(v, m):
    return (v + m - 1) // m * m


def _hw_config():
    """Returns (batch-tile cap, vmem_limit_bytes), generation dependent.

    v5e/v6e: 128 MiB physical VMEM -> big tiles.  v7x: 64 MiB -> cap TB at
    2048 rows of f32 x (24 MiB double-buffered).  Unknown -> conservative
    config that is legal on every generation.
    """
    try:
        cap = pltpu.get_tpu_info().vmem_capacity_bytes
    except Exception:
        cap = None
    if cap is not None and cap >= (96 << 20):
        return 4096, 96 << 20     # v5e / v6e (128 MiB VMEM)
    return 2048, 48 << 20         # v7x (64 MiB VMEM) or unknown


def _pick_tb(batch, tb_cap):
    """Batch tile size.

    * batch < 256: a single block equal to the full batch dim (always a legal
      block shape regardless of alignment; no padding, no boundary handling).
    * otherwise: at least two 128-multiple grid steps (lane-aligned for the
      transposed output) so the "parallel" batch axis can use both v7x
      TensorCores, capped by the per-generation VMEM budget.  A non-divisible
      tail block is handled by Pallas boundary masking.
    """
    if batch < 256:
        return batch
    tb = _round_up(pl.cdiv(batch, 2), 128)
    return min(tb, tb_cap)


def mlp_kernel(x_ref, w1_ref, b1_ref, w2t_ref, b2t_ref, o_ref):
    # fc1: cast the x tile to bf16 on the VPU (hidden under the x DMA), f32
    # accumulation on the MXU.
    x_bf = x_ref[...].astype(jnp.bfloat16)
    h = jnp.dot(x_bf, w1_ref[...], preferred_element_type=jnp.float32)
    # bias + ReLU in f32 (padded hidden lanes stay exactly 0).
    h = jnp.maximum(h + b1_ref[...], 0.0)
    # fc2, produced directly in the transposed (O_SUB, TB) layout so the store
    # is lane-dense over the batch dim.  Transpose in f32 (XLU, idle slots),
    # then bf16 so the MXU pass is single-pass on all generations.
    h_t = h.T.astype(jnp.bfloat16)                      # (H_PAD, TB)
    out_t = jnp.dot(w2t_ref[...], h_t,                  # (O_SUB, TB)
                    preferred_element_type=jnp.float32)
    o_ref[...] = (out_t + b2t_ref[...]).astype(o_ref.dtype)


def mymodel_forward(x, w1, b1, w2, b2):
    """x: (B, 1536); w1: (1536, 50); b1: (1, 50); w2: (50, 2); b2: (1, 2)."""
    B = x.shape[0]
    tb_cap, vmem_limit = _hw_config()
    TB = _pick_tb(B, tb_cap)
    grid = (pl.cdiv(B, TB),)

    # Weight/bias preprocessing is tiny (would normally be done once at load
    # time); zero padding is numerically exact (ReLU(0)=0, zero W2 rows).
    w1p = jnp.pad(w1.astype(jnp.bfloat16), ((0, 0), (0, H_PAD - H_DIM)))
    b1p = jnp.pad(b1.astype(jnp.float32).reshape(1, H_DIM),
                  ((0, 0), (0, H_PAD - H_DIM)))
    w2t = jnp.pad(w2.astype(jnp.bfloat16).T,
                  ((0, O_SUB - O_DIM), (0, H_PAD - H_DIM)))
    b2t = jnp.pad(b2.astype(jnp.float32).reshape(O_DIM, 1),
                  ((0, O_SUB - O_DIM), (0, 0)))

    flops = 2 * B * X_DIM * H_PAD + 2 * B * H_PAD * O_SUB
    bytes_accessed = (B * X_DIM * x.dtype.itemsize      # x read as-is from HBM
                      + X_DIM * H_PAD * 2               # w1 (bf16)
                      + O_SUB * H_PAD * 2               # w2^T (bf16)
                      + (H_PAD + O_SUB) * 4             # biases (f32)
                      + O_SUB * B * 4)                  # transposed f32 output

    out_t = pl.pallas_call(
        mlp_kernel,
        out_shape=jax.ShapeDtypeStruct((O_SUB, B), jnp.float32),
        grid_spec=pltpu.PrefetchScalarGridSpec(
            num_scalar_prefetch=0,
            grid=grid,
            in_specs=[
                pl.BlockSpec((TB, X_DIM), lambda i: (i, 0)),     # x: tiled over batch
                pl.BlockSpec((X_DIM, H_PAD), lambda i: (0, 0)),  # w1: resident
                pl.BlockSpec((1, H_PAD), lambda i: (0, 0)),      # b1: resident
                pl.BlockSpec((O_SUB, H_PAD), lambda i: (0, 0)),  # w2^T: resident
                pl.BlockSpec((O_SUB, 1), lambda i: (0, 0)),      # b2^T: resident
            ],
            out_specs=pl.BlockSpec((O_SUB, TB), lambda i: (0, i)),
        ),
        compiler_params=pltpu.CompilerParams(
            dimension_semantics=("parallel",),
            vmem_limit_bytes=vmem_limit),
        cost_estimate=pl.CostEstimate(
            flops=flops, transcendentals=0, bytes_accessed=bytes_accessed),
    )(x, w1p, b1p, w2t, b2t)

    # (O_SUB, B) -> (B, 2): strip sublane padding; tiny (2 x B) transpose.
    return out_t[:O_DIM, :].T


def init_params(key):
    """Deterministic init mimicking nn.Linear default (U[-1/sqrt(fan_in), +])."""
    k1, k2, k3, k4 = jax.random.split(key, 4)
    bound1 = 1.0 / jnp.sqrt(X_DIM)
    bound2 = 1.0 / jnp.sqrt(H_DIM)
    w1 = jax.random.uniform(k1, (X_DIM, H_DIM), jnp.float32, -bound1, bound1)
    b1 = jax.random.uniform(k2, (1, H_DIM), jnp.float32, -bound1, bound1)
    w2 = jax.random.uniform(k3, (H_DIM, O_DIM), jnp.float32, -bound2, bound2)
    b2 = jax.random.uniform(k4, (1, O_DIM), jnp.float32, -bound2, bound2)
    return w1, b1, w2, b2


if __name__ == "__main__":
    key = jax.random.PRNGKey(0)
    kx, kp = jax.random.split(key)

    B = 8
    x = jax.random.normal(kx, (B, X_DIM), jnp.float32)
    w1, b1, w2, b2 = init_params(kp)

    out = mymodel_forward(x, w1, b1, w2, b2)
    out = jax.block_until_ready(out)

    # Reference check in plain f32 JAX.  The kernel uses bf16 operands on the
    # MXU (f32 accumulation), so allow a slightly relaxed tolerance.
    ref = jnp.maximum(x @ w1 + b1, 0.0) @ w2 + b2
    assert out.shape == (B, O_DIM)
    assert jnp.allclose(out, ref, atol=5e-2, rtol=5e-2), (
        f"max abs err {jnp.max(jnp.abs(out - ref))}")

    print("KERNEL_OK")
</pallas_src>

<mosaic_0001>
module attributes {stable_mosaic.version = 11 : i64} {
  func.func @mlp_kernel(%arg0: i32, %arg1: memref<8x1536xf32, #tpu.memory_space<vmem>>, %arg2: memref<1536x128xbf16, #tpu.memory_space<vmem>>, %arg3: memref<1x128xf32, #tpu.memory_space<vmem>>, %arg4: memref<8x128xbf16, #tpu.memory_space<vmem>>, %arg5: memref<8x1xf32, #tpu.memory_space<vmem>>, %arg6: memref<8x8xf32, #tpu.memory_space<vmem>>) attributes {dimension_semantics = [#tpu.dimension_semantics<parallel>], iteration_bounds = array<i64: 1>, scalar_prefetch = 0 : i64, scratch_operands = 0 : i64, tpu.core_type = #tpu.core_type<tc>, window_params = [{transform_indices = @transform_0, window_bounds = array<i64: 8, 1536>}, {pipeline_mode = #tpu.pipeline_mode<synchronous>, transform_indices = @transform_1, window_bounds = array<i64: 1536, 128>}, {pipeline_mode = #tpu.pipeline_mode<synchronous>, transform_indices = @transform_2, window_bounds = array<i64: 1, 128>}, {pipeline_mode = #tpu.pipeline_mode<synchronous>, transform_indices = @transform_3, window_bounds = array<i64: 8, 128>}, {pipeline_mode = #tpu.pipeline_mode<synchronous>, transform_indices = @transform_4, window_bounds = array<i64: 8, 1>}, {transform_indices = @transform_5, window_bounds = array<i64: 8, 8>}]} {
    %c0 = arith.constant 0 : index
    %c0_0 = arith.constant 0 : index
    %0 = vector.load %arg1[%c0, %c0_0] : memref<8x1536xf32, #tpu.memory_space<vmem>>, vector<8x1536xf32>
    %1 = arith.truncf %0 : vector<8x1536xf32> to vector<8x1536xbf16>
    %c0_1 = arith.constant 0 : index
    %c0_2 = arith.constant 0 : index
    %2 = vector.load %arg2[%c0_1, %c0_2] : memref<1536x128xbf16, #tpu.memory_space<vmem>>, vector<1536x128xbf16>
    %cst = arith.constant dense<0.000000e+00> : vector<8x128xf32>
    %3 = tpu.matmul %1, %2, %cst {dimension_numbers = #tpu.dot_dimension_numbers<[1], [0], [0], [1], [0, 0, 1, 1], [], []>} : vector<8x1536xbf16>, vector<1536x128xbf16>, vector<8x128xf32> -> vector<8x128xf32>
    %c0_3 = arith.constant 0 : index
    %c0_4 = arith.constant 0 : index
    %4 = vector.load %arg3[%c0_3, %c0_4] : memref<1x128xf32, #tpu.memory_space<vmem>>, vector<1x128xf32>
    %5 = vector.broadcast %4 : vector<1x128xf32> to vector<8x128xf32>
    %6 = arith.addf %3, %5 : vector<8x128xf32>
    %cst_5 = arith.constant 0.000000e+00 : f32
    %7 = vector.broadcast %cst_5 : f32 to vector<8x128xf32>
    %8 = arith.maximumf %6, %7 : vector<8x128xf32>
    %9 = tpu.transpose %8, [1, 0] : vector<8x128xf32> -> vector<128x8xf32>
    %10 = arith.truncf %9 : vector<128x8xf32> to vector<128x8xbf16>
    %c0_6 = arith.constant 0 : index
    %c0_7 = arith.constant 0 : index
    %11 = vector.load %arg4[%c0_6, %c0_7] : memref<8x128xbf16, #tpu.memory_space<vmem>>, vector<8x128xbf16>
    %cst_8 = arith.constant dense<0.000000e+00> : vector<8x8xf32>
    %12 = tpu.matmul %11, %10, %cst_8 {dimension_numbers = #tpu.dot_dimension_numbers<[1], [0], [0], [1], [0, 0, 1, 1], [], []>} : vector<8x128xbf16>, vector<128x8xbf16>, vector<8x8xf32> -> vector<8x8xf32>
    %c0_9 = arith.constant 0 : index
    %c0_10 = arith.constant 0 : index
    %13 = vector.load %arg5[%c0_9, %c0_10] : memref<8x1xf32, #tpu.memory_space<vmem>>, vector<8x1xf32>
    %14 = vector.broadcast %13 : vector<8x1xf32> to vector<8x8xf32>
    %15 = arith.addf %12, %14 : vector<8x8xf32>
    %c0_11 = arith.constant 0 : index
    %c0_12 = arith.constant 0 : index
    %16 = vector.load %arg6[%c0_11, %c0_12] : memref<8x8xf32, #tpu.memory_space<vmem>>, vector<8x8xf32>
    tpu.vector_store %arg6[%c0_11, %c0_12], %15 {strides = array<i32>} : memref<8x8xf32, #tpu.memory_space<vmem>>, vector<8x8xf32>,
    return
  }
  func.func @transform_0(%arg0: i32) -> (i32, i32) {
    %c0_i32 = arith.constant 0 : i32
    %c0_i32_0 = arith.constant 0 : i32
    return %arg0, %c0_i32 : i32, i32
  }
  func.func @transform_1(%arg0: i32) -> (i32, i32) {
    %c0_i32 = arith.constant 0 : i32
    %c0_i32_0 = arith.constant 0 : i32
    %c0_i32_1 = arith.constant 0 : i32
    return %c0_i32, %c0_i32_0 : i32, i32
  }
  func.func @transform_2(%arg0: i32) -> (i32, i32) {
    %c0_i32 = arith.constant 0 : i32
    %c0_i32_0 = arith.constant 0 : i32
    %c0_i32_1 = arith.constant 0 : i32
    return %c0_i32, %c0_i32_0 : i32, i32
  }
  func.func @transform_3(%arg0: i32) -> (i32, i32) {
    %c0_i32 = arith.constant 0 : i32
    %c0_i32_0 = arith.constant 0 : i32
    %c0_i32_1 = arith.constant 0 : i32
    return %c0_i32, %c0_i32_0 : i32, i32
  }
  func.func @transform_4(%arg0: i32) -> (i32, i32) {
    %c0_i32 = arith.constant 0 : i32
    %c0_i32_0 = arith.constant 0 : i32
    %c0_i32_1 = arith.constant 0 : i32
    return %c0_i32, %c0_i32_0 : i32, i32
  }
  func.func @transform_5(%arg0: i32) -> (i32, i32) {
    %c0_i32 = arith.constant 0 : i32
    %c0_i32_0 = arith.constant 0 : i32
    return %c0_i32, %arg0 : i32, i32
  }
}

</mosaic_0001>

<bundles_post_ra>
// kernel: tpu_custom_call.1
= control target key start
LH: loop header
LB: loop body
LE: loop exit
PB: predicated region body
PF: predicated region fallthrough
CT: control target
= control target key end

     0   :  { %10 = vsyncpa [#allocation3], 0  ;;  %s1718_s0 = inlined_call_operand.hbm [shape: f32[8,1536], index: 0, kind: input, shape index: {}]   ;;  %s1719_s1 = inlined_call_operand.hbm [shape: bf16[1536,128], index: 1, kind: input, shape index: {}]   ;;  %s1720_s2 = inlined_call_operand.vmem [shape: f32[1,128], index: 2, kind: input, shape index: {}]   ;;  %s1721_s3 = inlined_call_operand.vmem [shape: bf16[8,128], index: 3, kind: input, shape index: {}]   ;;  %s1722_s4 = inlined_call_operand.vmem [shape: f32[8,1], index: 4, kind: input, shape index: {}]   ;;  %s1723_s5 = inlined_call_operand.hbm [shape: f32[8,8], index: 5, kind: output, shape index: {}]  }
   0x1   :  { %11 = vsyncpa [#allocation6], 0 }
   0x2   :  { %12 = vsyncpa [#allocation4], 0  ;;  %s1628_s18 = smov [#allocation2]   ;;  %s1629_s20 = smov [#allocation5]  }
   0x3   :  { %s19_s19 = sshll.u32 %s1628_s18, 4  ;;  %s28_s21 = sshll.u32 %s1629_s20, 4  ;;  %s20_s19 = int_to_ptr.vmem [resolvable:$true] %s19_s19  ;;  %s1666_s21 = int_to_ptr.vmem [resolvable:$true] %s28_s21 }
   0x4   :  { %s1556_s24 = scalar_lea.hbm %s1718_s0, 1536 }
   0x5   :  { %p1557_p0 = scmp.ne.s32.totalorder %s1718_s0, %s1556_s24  ;;  %p1560_p1 = scmp.lt.u32.totalorder %s1556_s24, %s1718_s0 }
   0x7   :  { %p1562_p2 = pnand %p1560_p1, %p1557_p0 }
   0x9   :  { %1565 = shalt.err (!%p1562_p2)
}
   0xa   :  { %s1566_s29 = scalar_lea.vmem %s20_s19, 1536  ;;  %p1571_p4 = scmp.lt.s32.totalorder %s20_s19, %s20_s19 }
   0xb   :  { %p1567_p3 = scmp.ne.s32.totalorder %s20_s19, %s1566_s29  ;;  %p1572_p5 = scmp.lt.s32.totalorder %s1566_s29, %s1566_s29 }
   0xd   :  { %p1573_p6 = por %p1572_p5, %p1571_p4 }
   0xf   :  { %p1574_p7 = pnand %p1573_p6, %p1567_p3 }
  0x11   :  { %1577 = shalt.err (!%p1574_p7)
}
  0x12   :  { %22 = dma.hbm_to_vmem [thread:$0]  %s1718_s0, 1536, %s20_s19, [#allocation3]  }
  0x13   :  { %s1578_s9 = scalar_lea.hbm %s1719_s1, 12288 }
  0x14   :  { %p1579_p8 = scmp.ne.s32.totalorder %s1719_s1, %s1578_s9  ;;  %p1582_p9 = scmp.lt.u32.totalorder %s1578_s9, %s1719_s1 }
  0x16   :  { %p1584_p10 = pnand %p1582_p9, %p1579_p8 }
  0x18   :  { %1587 = shalt.err (!%p1584_p10)
}
  0x19   :  { %s1588_s14 = scalar_lea.vmem %s1666_s21, 12288  ;;  %p1593_p12 = scmp.lt.s32.totalorder %s1666_s21, %s1666_s21 }
  0x1a   :  { %p1589_p11 = scmp.ne.s32.totalorder %s1666_s21, %s1588_s14  ;;  %p1594_p13 = scmp.lt.s32.totalorder %s1588_s14, %s1588_s14 }
  0x1c   :  { %p1595_p0 = por %p1594_p13, %p1593_p12 }
  0x1e   :  { %p1596_p1 = pnand %p1595_p0, %p1589_p11 }
  0x20   :  { %1599 = shalt.err (!%p1596_p1)
}
  0x21   :  { %s1630_s0 = smov 64   ;;  %s1631_s15 = smov 4  }
  0x22   :  { %34 = dma.hbm_to_vmem [thread:$0]  %s1719_s1, 12288, %s1666_s21, [#allocation6], %s1630_s0, %s1630_s0, %s1631_s15  }
  0x23   :  { %1622 = dma.done.wait [#allocation3], 1536  }
  0x24   :  { %1623 = vsyncadd [#allocation3], 4294965760 }
  0x25   :  { %1624 = dma.done.wait [#allocation6], 12288  }
  0x26   :  { %1625 = vsyncadd [#allocation6], 4294955008  ;;  %v1460_v0 = vld [vmem:[#allocation5 + $0x40] sm:$0xff]   ;;  %v1464_v4 = vld [vmem:[#allocation5 + $0x48] sm:$0xff]   ;;  %vm1633_vm0 = vmmov 0   ;;  %s1635_s21 = smov [#allocation7]  }
  0x27   :  { %v1461_v1 = vld [vmem:[#allocation5 + $0xc0] sm:$0xff]   ;;  %1290 = vmatprep.subr.bf16.mxu0 %v1460_v0  ;;  %v1465_v5 = vld [vmem:[#allocation5 + $0xc8] sm:$0xff]   ;;  %v1468_v8 = vld [vmem:[#allocation5 + $0x50] sm:$0xff]   ;;  %s1183_s22 = sshll.u32 %s1635_s21, 4  ;;  %vm1175_vm1 = vcmask 64512   ;;  %s1184_s22 = int_to_ptr.vmem [resolvable:$true] %s1183_s22 }
  0x28   :  { %v1462_v2 = vld [vmem:[#allocation5] sm:$0xff]   ;;  %1312 = vmatprep.subr.bf16.mxu1 %v1461_v1  ;;  %v1466_v6 = vld [vmem:[#allocation5 + $0x8] sm:$0xff]   ;;  %v1469_v9 = vld [vmem:[#allocation5 + $0xd0] sm:$0xff]   ;;  %s1600_s23 = scalar_lea.vmem %s1184_s22, 128  ;;  %p1605_p3 = scmp.lt.s32.totalorder %s1184_s22, %s1184_s22 }
  0x29   :  { %v1463_v3 = vld [vmem:[#allocation5 + $0x80] sm:$0xff]   ;;  %1291 = vmatpush3.bf16.msra.mxu0 %v1462_v2  ;;  %v1467_v7 = vld [vmem:[#allocation5 + $0x88] sm:$0xff]   ;;  %v1470_v10 = vld [vmem:[#allocation5 + $0x10] sm:$0xff]   ;;  %p1601_p2 = scmp.ne.s32.totalorder %s1184_s22, %s1600_s23  ;;  %p1606_p4 = scmp.lt.s32.totalorder %s1600_s23, %s1600_s23 }
  0x2a   :  { %1313 = vmatpush3.bf16.msra.mxu1 %v1463_v3  ;;  %1292 = vmatprep.subr.bf16.mxu0 %v1464_v4  ;;  %v1471_v11 = vld [vmem:[#allocation5 + $0x90] sm:$0xff]   ;;  %v1472_v12 = vld [vmem:[#allocation5 + $0x58] sm:$0xff]   ;;  %v1476_v16 = vld [vmem:[#allocation5 + $0x60] sm:$0xff]  }
  0x2b   :  { %1314 = vmatprep.subr.bf16.mxu1 %v1465_v5  ;;  %v1473_v13 = vld [vmem:[#allocation5 + $0xd8] sm:$0xff]   ;;  %v1477_v17 = vld [vmem:[#allocation5 + $0xe0] sm:$0xff]   ;;  %v1480_v20 = vld [vmem:[#allocation5 + $0x68] sm:$0xff]   ;;  %p1607_p5 = por %p1606_p4, %p1605_p3 }
  0x2c   :  { %v1474_v14 = vld [vmem:[#allocation5 + $0x18] sm:$0xff]   ;;  %v1478_v18 = vld [vmem:[#allocation5 + $0x20] sm:$0xff]   ;;  %v1481_v21 = vld [vmem:[#allocation5 + $0xe8] sm:$0xff]  }
  0x2d   :  { %1293 = vmatpush3.bf16.msra.mxu0 %v1466_v6  ;;  %v1475_v15 = vld [vmem:[#allocation5 + $0x98] sm:$0xff]   ;;  %v1479_v19 = vld [vmem:[#allocation5 + $0xa0] sm:$0xff]   ;;  %v1482_v22 = vld [vmem:[#allocation5 + $0x28] sm:$0xff]   ;;  %p1608_p6 = pnand %p1607_p5, %p1601_p2 }
  0x2e   :  { %1315 = vmatpush3.bf16.msra.mxu1 %v1467_v7  ;;  %1294 = vmatprep.subr.bf16.mxu0 %v1468_v8  ;;  %v1483_v23 = vld [vmem:[#allocation5 + $0xa8] sm:$0xff]   ;;  %v1484_v24 = vld [vmem:[#allocation5 + $0x70] sm:$0xff]   ;;  %v1488_v28 = vld [vmem:[#allocation5 + $0x78] sm:$0xff]  }
  0x2f   :  { %1316 = vmatprep.subr.bf16.mxu1 %v1469_v9  ;;  %v1485_v25 = vld [vmem:[#allocation5 + $0xf0] sm:$0xff]   ;;  %v1489_v29 = vld [vmem:[#allocation5 + $0xf8] sm:$0xff]   ;;  %v49_v32 = vld [vmem:[#allocation2 + $0x8] sm:$0xff] }
  0x30   :  { %v1486_v26 = vld [vmem:[#allocation5 + $0x30] sm:$0xff]   ;;  %v1490_v30 = vld [vmem:[#allocation5 + $0x38] sm:$0xff]   ;;  %v48_v34 = vld [vmem:[#allocation2] sm:$0xff]  ;;  %v61_v35 = vpack.c.bf16 %v49_v32, %v49_v32 }
  0x31   :  { %1295 = vmatpush3.bf16.msra.mxu0 %v1470_v10  ;;  %v1487_v27 = vld [vmem:[#allocation5 + $0xb0] sm:$0xff]   ;;  %v1491_v31 = vld [vmem:[#allocation5 + $0xb8] sm:$0xff]   ;;  %v60_v37 = vpack.c.bf16 %v48_v34, %v48_v34  ;;  %v1492_v40 = vld [vmem:[#allocation5 + $0x140] sm:$0xff]  }
  0x32   :  { %1317 = vmatpush3.bf16.msra.mxu1 %v1471_v11  ;;  %1296 = vmatprep.subr.bf16.mxu0 %v1472_v12  ;;  %v51_v33 = vld [vmem:[#allocation2 + $0x18] sm:$0xff]  ;;  %v50_v38 = vld [vmem:[#allocation2 + $0x10] sm:$0xff]  ;;  %v1493_v41 = vld [vmem:[#allocation5 + $0x1c0] sm:$0xff]  }
  0x33   :  { %1318 = vmatprep.subr.bf16.mxu1 %v1473_v13  ;;  %v63_v36 = vpack.c.bf16 %v51_v33, %v51_v33  ;;  %v62_v39 = vpack.c.bf16 %v50_v38, %v50_v38  ;;  %879 = vmatprep.mubr.bf16.mxu0 %v61_v35  ;;  %v1494_v42 = vld [vmem:[#allocation5 + $0x100] sm:$0xff]   ;;  %v1496_v44 = vld [vmem:[#allocation5 + $0x148] sm:$0xff]   ;;  %v1500_v48 = vld [vmem:[#allocation5 + $0x150] sm:$0xff]  }
  0x34   :  { %v1495_v43 = vld [vmem:[#allocation5 + $0x180] sm:$0xff]   ;;  %v1497_v45 = vld [vmem:[#allocation5 + $0x1c8] sm:$0xff]   ;;  %v1501_v49 = vld [vmem:[#allocation5 + $0x1d0] sm:$0xff]  }
  0x35   :  { %1297 = vmatpush3.bf16.msra.mxu0 %v1474_v14  ;;  %919 = vmatprep.mubr.bf16.mxu1 %v63_v36  ;;  %v1498_v46 = vld [vmem:[#allocation5 + $0x108] sm:$0xff]   ;;  %v1502_v50 = vld [vmem:[#allocation5 + $0x110] sm:$0xff]   ;;  %v1504_v52 = vld [vmem:[#allocation5 + $0x158] sm:$0xff]  }
  0x36   :  { %1319 = vmatpush3.bf16.msra.mxu1 %v1475_v15  ;;  %1298 = vmatprep.subr.bf16.mxu0 %v1476_v16  ;;  %v1499_v47 = vld [vmem:[#allocation5 + $0x188] sm:$0xff]   ;;  %v1503_v51 = vld [vmem:[#allocation5 + $0x190] sm:$0xff]   ;;  %v1505_v53 = vld [vmem:[#allocation5 + $0x1d8] sm:$0xff]  }
  0x37   :  { %1320 = vmatprep.subr.bf16.mxu1 %v1477_v17  ;;  %v1506_v54 = vld [vmem:[#allocation5 + $0x118] sm:$0xff]   ;;  %v1508_v56 = vld [vmem:[#allocation5 + $0x160] sm:$0xff]   ;;  %v1512_v60 = vld [vmem:[#allocation5 + $0x168] sm:$0xff]  }
  0x38   :  { %v1507_v55 = vld [vmem:[#allocation5 + $0x198] sm:$0xff]   ;;  %v1509_v57 = vld [vmem:[#allocation5 + $0x1e0] sm:$0xff]   ;;  %v1513_v61 = vld [vmem:[#allocation5 + $0x1e8] sm:$0xff]  }
  0x39   :  { %1299 = vmatpush3.bf16.msra.mxu0 %v1478_v18  ;;  %v1510_v58 = vld [vmem:[#allocation5 + $0x120] sm:$0xff]   ;;  %v1514_v62 = vld [vmem:[#allocation5 + $0x128] sm:$0xff]   ;;  %v1516_v0 = vld [vmem:[#allocation5 + $0x170] sm:$0xff]  }
  0x3a   :  { %1321 = vmatpush3.bf16.msra.mxu1 %v1479_v19  ;;  %1300 = vmatprep.subr.bf16.mxu0 %v1480_v20  ;;  %v1511_v59 = vld [vmem:[#allocation5 + $0x1a0] sm:$0xff]   ;;  %v1515_v63 = vld [vmem:[#allocation5 + $0x1a8] sm:$0xff]   ;;  %v1517_v1 = vld [vmem:[#allocation5 + $0x1f0] sm:$0xff]  }
  0x3b   :  { %1322 = vmatprep.subr.bf16.mxu1 %v1481_v21  ;;  %v1518_v2 = vld [vmem:[#allocation5 + $0x130] sm:$0xff]   ;;  %v1520_v4 = vld [vmem:[#allocation5 + $0x178] sm:$0xff]   ;;  %v53_v8 = vld [vmem:[#allocation2 + $0x28] sm:$0xff] }
  0x3c   :  { %v1519_v3 = vld [vmem:[#allocation5 + $0x1b0] sm:$0xff]   ;;  %v1521_v5 = vld [vmem:[#allocation5 + $0x1f8] sm:$0xff]   ;;  %v65_v10 = vpack.c.bf16 %v53_v8, %v53_v8  ;;  %v52_v12 = vld [vmem:[#allocation2 + $0x20] sm:$0xff] }
  0x3d   :  { %1301 = vmatpush3.bf16.msra.mxu0 %v1482_v22  ;;  %v1522_v6 = vld [vmem:[#allocation5 + $0x138] sm:$0xff]   ;;  %v54_v13 = vld [vmem:[#allocation2 + $0x30] sm:$0xff]  ;;  %v64_v14 = vpack.c.bf16 %v52_v12, %v52_v12  ;;  %v1524_v16 = vld [vmem:[#allocation5 + $0x240] sm:$0xff]  }
  0x3e   :  { %1323 = vmatpush3.bf16.msra.mxu1 %v1483_v23  ;;  %1302 = vmatprep.subr.bf16.mxu0 %v1484_v24  ;;  %v1523_v7 = vld [vmem:[#allocation5 + $0x1b8] sm:$0xff]   ;;  %v66_v15 = vpack.c.bf16 %v54_v13, %v54_v13  ;;  %v1525_v17 = vld [vmem:[#allocation5 + $0x2c0] sm:$0xff]   ;;  %v1528_v20 = vld [vmem:[#allocation5 + $0x248] sm:$0xff]  }
  0x3f   :  { %1324 = vmatprep.subr.bf16.mxu1 %v1485_v25  ;;  %v55_v9 = vld [vmem:[#allocation2 + $0x38] sm:$0xff]  ;;  %v1526_v18 = vld [vmem:[#allocation5 + $0x200] sm:$0xff]   ;;  %v1529_v21 = vld [vmem:[#allocation5 + $0x2c8] sm:$0xff]  }
  0x40   :  { %v67_v11 = vpack.c.bf16 %v55_v9, %v55_v9  ;;  %v1527_v19 = vld [vmem:[#allocation5 + $0x280] sm:$0xff]   ;;  %v1530_v22 = vld [vmem:[#allocation5 + $0x208] sm:$0xff]   ;;  %v1532_v24 = vld [vmem:[#allocation5 + $0x250] sm:$0xff]  }
  0x41   :  { %1303 = vmatpush3.bf16.msra.mxu0 %v1486_v26  ;;  %v1531_v23 = vld [vmem:[#allocation5 + $0x288] sm:$0xff]   ;;  %v1533_v25 = vld [vmem:[#allocation5 + $0x2d0] sm:$0xff]   ;;  %v1540_v32 = vld [vmem:[#allocation5 + $0x260] sm:$0xff]  }
  0x42   :  { %1325 = vmatpush3.bf16.msra.mxu1 %v1487_v27  ;;  %1304 = vmatprep.subr.bf16.mxu0 %v1488_v28  ;;  %v1534_v26 = vld [vmem:[#allocation5 + $0x210] sm:$0xff]   ;;  %v1536_v28 = vld [vmem:[#allocation5 + $0x258] sm:$0xff]   ;;  %v1541_v33 = vld [vmem:[#allocation5 + $0x2e0] sm:$0xff]  }
  0x43   :  { %1326 = vmatprep.subr.bf16.mxu1 %v1489_v29  ;;  %v1535_v27 = vld [vmem:[#allocation5 + $0x290] sm:$0xff]   ;;  %v1537_v29 = vld [vmem:[#allocation5 + $0x2d8] sm:$0xff]   ;;  %v1542_v34 = vld [vmem:[#allocation5 + $0x220] sm:$0xff]  }
  0x44   :  { %v1543_v35 = vld [vmem:[#allocation5 + $0x2a0] sm:$0xff]   ;;  %v1544_v36 = vld [vmem:[#allocation5 + $0x268] sm:$0xff]  }
  0x45   :  { %1305 = vmatpush3.bf16.msra.mxu0 %v1490_v30  ;;  %v1538_v30 = vld [vmem:[#allocation5 + $0x218] sm:$0xff]   ;;  %v1546_v38 = vld [vmem:[#allocation5 + $0x228] sm:$0xff]  }
  0x46   :  { %1327 = vmatpush3.bf16.msra.mxu1 %v1491_v31  ;;  %1334 = vmatprep.subr.bf16.mxu0 %v1492_v40  ;;  %v1539_v31 = vld [vmem:[#allocation5 + $0x298] sm:$0xff]   ;;  %v1548_v40 = vld [vmem:[#allocation5 + $0x270] sm:$0xff]  }
  0x47   :  { %1356 = vmatprep.subr.bf16.mxu1 %v1493_v41  ;;  %v1549_v41 = vld [vmem:[#allocation5 + $0x2f0] sm:$0xff]  }
  0x48   :  { %880 = vmatmul.mubr.bf16.vlgmr.msra.gmra.mrb[0].mxu0 %v60_v37  ;;  %v1545_v37 = vld [vmem:[#allocation5 + $0x2e8] sm:$0xff]  }
  0x49   :  { %920 = vmatmul.mubr.bf16.vlgmr.msra.gmra.mrb[0].mxu1 %v62_v39  ;;  %1335 = vmatpush3.bf16.msra.mxu0 %v1494_v42  ;;  %v1547_v39 = vld [vmem:[#allocation5 + $0x2a8] sm:$0xff]   ;;  %v1550_v42 = vld [vmem:[#allocation5 + $0x230] sm:$0xff]  }
  0x4a   :  { %1357 = vmatpush3.bf16.msra.mxu1 %v1495_v43  ;;  %1336 = vmatprep.subr.bf16.mxu0 %v1496_v44  ;;  %v1551_v43 = vld [vmem:[#allocation5 + $0x2b0] sm:$0xff]   ;;  %v1552_v44 = vld [vmem:[#allocation5 + $0x278] sm:$0xff]  }
  0x4b   :  { %1358 = vmatprep.subr.bf16.mxu1 %v1497_v45  ;;  %959 = vmatprep.mubr.bf16.mxu0 %v65_v10  ;;  %v1553_v45 = vld [vmem:[#allocation5 + $0x2f8] sm:$0xff]  }
  0x4c   :  { %999 = vmatprep.mubr.bf16.mxu1 %v67_v11 }
  0x4d   :  { %1337 = vmatpush3.bf16.msra.mxu0 %v1498_v46  ;;  %v1554_v46 = vld [vmem:[#allocation5 + $0x238] sm:$0xff]  }
  0x4e   :  { %1359 = vmatpush3.bf16.msra.mxu1 %v1499_v47  ;;  %1338 = vmatprep.subr.bf16.mxu0 %v1500_v48  ;;  %v1555_v47 = vld [vmem:[#allocation5 + $0x2b8] sm:$0xff]   ;;  %v57_v48 = vld [vmem:[#allocation2 + $0x48] sm:$0xff] }
  0x4f   :  { %1360 = vmatprep.subr.bf16.mxu1 %v1501_v49  ;;  %v69_v49 = vpack.c.bf16 %v57_v48, %v57_v48 }
  0x51   :  { %1339 = vmatpush3.bf16.msra.mxu0 %v1502_v50  ;;  %v59_v50 = vld [vmem:[#allocation2 + $0x58] sm:$0xff] }
  0x52   :  { %1361 = vmatpush3.bf16.msra.mxu1 %v1503_v51  ;;  %1340 = vmatprep.subr.bf16.mxu0 %v1504_v52  ;;  %v56_v51 = vld [vmem:[#allocation2 + $0x40] sm:$0xff]  ;;  %v58_v52 = vld [vmem:[#allocation2 + $0x50] sm:$0xff] }
  0x53   :  { %1362 = vmatprep.subr.bf16.mxu1 %v1505_v53  ;;  %v71_v53 = vpack.c.bf16 %v59_v50, %v59_v50 }
  0x55   :  { %1341 = vmatpush3.bf16.msra.mxu0 %v1506_v54  ;;  %v68_v54 = vpack.c.bf16 %v56_v51, %v56_v51 }
  0x56   :  { %1363 = vmatpush3.bf16.msra.mxu1 %v1507_v55  ;;  %1342 = vmatprep.subr.bf16.mxu0 %v1508_v56  ;;  %v70_v55 = vpack.c.bf16 %v58_v52, %v58_v52 }
  0x57   :  { %1364 = vmatprep.subr.bf16.mxu1 %v1509_v57 }
  0x59   :  { %1343 = vmatpush3.bf16.msra.mxu0 %v1510_v58  ;;  %v1193_v58 = vld [vmem:[%s1720_s2] ss:$0 sm:$0xff] }
  0x5a   :  { %1365 = vmatpush3.bf16.msra.mxu1 %v1511_v59  ;;  %1344 = vmatprep.subr.bf16.mxu0 %v1512_v60 }
  0x5b   :  { %1366 = vmatprep.subr.bf16.mxu1 %v1513_v61 }
  0x5d   :  { %1345 = vmatpush3.bf16.msra.mxu0 %v1514_v62 }
  0x5e   :  { %1367 = vmatpush3.bf16.msra.mxu1 %v1515_v63  ;;  %1346 = vmatprep.subr.bf16.mxu0 %v1516_v0 }
  0x5f   :  { %1368 = vmatprep.subr.bf16.mxu1 %v1517_v1 }
  0x61   :  { %1347 = vmatpush3.bf16.msra.mxu0 %v1518_v2 }
  0x62   :  { %1369 = vmatpush3.bf16.msra.mxu1 %v1519_v3  ;;  %1348 = vmatprep.subr.bf16.mxu0 %v1520_v4 }
  0x63   :  { %1370 = vmatprep.subr.bf16.mxu1 %v1521_v5 }
  0x65   :  { %1349 = vmatpush3.bf16.msra.mxu0 %v1522_v6 }
  0x66   :  { %1371 = vmatpush3.bf16.msra.mxu1 %v1523_v7  ;;  %1378 = vmatprep.subr.bf16.mxu0 %v1524_v16 }
  0x67   :  { %1400 = vmatprep.subr.bf16.mxu1 %v1525_v17 }
  0x68   :  { %960 = vmatmul.mubr.bf16.vlgmr.msra.gmra.mrb[4].mxu0 %v64_v14 }
  0x69   :  { %1000 = vmatmul.mubr.bf16.vlgmr.msra.gmra.mrb[4].mxu1 %v66_v15  ;;  %1379 = vmatpush3.bf16.msra.mxu0 %v1526_v18 }
  0x6a   :  { %1401 = vmatpush3.bf16.msra.mxu1 %v1527_v19  ;;  %1380 = vmatprep.subr.bf16.mxu0 %v1528_v20 }
  0x6b   :  { %1402 = vmatprep.subr.bf16.mxu1 %v1529_v21  ;;  %1039 = vmatprep.mubr.bf16.mxu0 %v69_v49 }
  0x6c   :  { %1079 = vmatprep.mubr.bf16.mxu1 %v71_v53 }
  0x6d   :  { %1381 = vmatpush3.bf16.msra.mxu0 %v1530_v22 }
  0x6e   :  { %1403 = vmatpush3.bf16.msra.mxu1 %v1531_v23  ;;  %1382 = vmatprep.subr.bf16.mxu0 %v1532_v24 }
  0x6f   :  { %1404 = vmatprep.subr.bf16.mxu1 %v1533_v25 }
  0x71   :  { %1383 = vmatpush3.bf16.msra.mxu0 %v1534_v26 }
  0x72   :  { %1405 = vmatpush3.bf16.msra.mxu1 %v1535_v27  ;;  %1384 = vmatprep.subr.bf16.mxu0 %v1536_v28 }
  0x73   :  { %1406 = vmatprep.subr.bf16.mxu1 %v1537_v29 }
  0x75   :  { %1385 = vmatpush3.bf16.msra.mxu0 %v1538_v30  ;;  %v1632_v30 = vmov 0.0  }
  0x76   :  { %1407 = vmatpush3.bf16.msra.mxu1 %v1539_v31  ;;  %1386 = vmatprep.subr.bf16.mxu0 %v1540_v32  ;;  %v1634_v31 = vmov 0   ;;  %v1129_v32 = vld [vmem:[%s1722_s4] sm:$0xff] }
  0x77   :  { %1408 = vmatprep.subr.bf16.mxu1 %v1541_v33 }
  0x79   :  { %1387 = vmatpush3.bf16.msra.mxu0 %v1542_v34 }
  0x7a   :  { %1409 = vmatpush3.bf16.msra.mxu1 %v1543_v35  ;;  %1388 = vmatprep.subr.bf16.mxu0 %v1544_v36 }
  0x7b   :  { %1410 = vmatprep.subr.bf16.mxu1 %v1545_v37 }
  0x7d   :  { %1389 = vmatpush3.bf16.msra.mxu0 %v1546_v38 }
  0x7e   :  { %1411 = vmatpush3.bf16.msra.mxu1 %v1547_v39  ;;  %1390 = vmatprep.subr.bf16.mxu0 %v1548_v40 }
  0x7f   :  { %1412 = vmatprep.subr.bf16.mxu1 %v1549_v41 }
  0x81   :  { %1391 = vmatpush3.bf16.msra.mxu0 %v1550_v42 }
  0x82   :  { %1413 = vmatpush3.bf16.msra.mxu1 %v1551_v43  ;;  %1392 = vmatprep.subr.bf16.mxu0 %v1552_v44 }
  0x83   :  { %1414 = vmatprep.subr.bf16.mxu1 %v1553_v45 }
  0x85   :  { %1393 = vmatpush3.bf16.msra.mxu0 %v1554_v46 }
  0x86   :  { %1415 = vmatpush3.bf16.msra.mxu1 %v1555_v47  ;;  %1431 = vmatprep.subr.bf16.mxu0 %v1632_v30 }
  0x88   :  { %1040 = vmatmul.mubr.bf16.vlgmr.msra.gmra.mrb[8].mxu0 %v68_v54 }
  0x89   :  { %1080 = vmatmul.mubr.bf16.vlgmr.msra.gmra.mrb[8].mxu1 %v70_v55  ;;  %1447 = vmatprep.mubr.msk.bf16.mxu0 %vm1633_vm0, %v1632_v30 }
 0x11b   :  { %v1306_v56 = vpop.f32.mrb[0].mxu0 }
 0x11c   :  { %v1328_v57 = vpop.f32.mrb[0].mxu1  ;;  %v1307_v59 = vpop.f32.mrb[1].mxu0 }
 0x11d   :  { %v1329_v60 = vpop.f32.mrb[1].mxu1  ;;  %v1308_v61 = vadd.f32 %v1307_v59, %v1306_v56  ;;  %v1309_v63 = vpop.f32.mrb[2].mxu0 }
 0x11e   :  { %v1330_v62 = vadd.f32 %v1329_v60, %v1328_v57  ;;  %v1331_v0 = vpop.f32.mrb[2].mxu1  ;;  %v1310_v1 = vpop.f32.mrb[3].mxu0  ;;  %v1128_v57 = vld [vmem:[%s1721_s3] sm:$0xf] }
 0x11f   :  { %v1332_v2 = vpop.f32.mrb[3].mxu1  ;;  %v882_v3 = vadd.f32 %v1308_v61, %v1193_v58 }
 0x121   :  { %v922_v4 = vadd.f32 %v1330_v62, %v882_v3 }
 0x13b   :  { %v1350_v5 = vpop.f32.mrb[4].mxu0 }
 0x13c   :  { %v1372_v6 = vpop.f32.mrb[4].mxu1  ;;  %v1351_v7 = vpop.f32.mrb[5].mxu0 }
 0x13d   :  { %v1352_v8 = vadd.f32 %v1351_v7, %v1350_v5  ;;  %v1373_v9 = vpop.f32.mrb[5].mxu1  ;;  %v1353_v10 = vpop.f32.mrb[6].mxu0 }
 0x13e   :  { %v1374_v11 = vadd.f32 %v1373_v9, %v1372_v6  ;;  %v1375_v12 = vpop.f32.mrb[6].mxu1  ;;  %v1354_v13 = vpop.f32.mrb[7].mxu0 }
 0x13f   :  { %v962_v14 = vadd.f32 %v1352_v8, %v922_v4  ;;  %v1376_v15 = vpop.f32.mrb[7].mxu1 }
 0x141   :  { %v1002_v16 = vadd.f32 %v1374_v11, %v962_v14 }
 0x15b   :  { %v1394_v17 = vpop.f32.mrb[8].mxu0 }
 0x15c   :  { %v1416_v18 = vpop.f32.mrb[8].mxu1  ;;  %v1395_v19 = vpop.f32.mrb[9].mxu0 }
 0x15d   :  { %v1396_v20 = vadd.f32 %v1395_v19, %v1394_v17  ;;  %v1417_v21 = vpop.f32.mrb[9].mxu1  ;;  %v1397_v22 = vpop.f32.mrb[10].mxu0 }
 0x15e   :  { %v1418_v23 = vadd.f32 %v1417_v21, %v1416_v18  ;;  %v1419_v24 = vpop.f32.mrb[10].mxu1  ;;  %v1398_v25 = vpop.f32.mrb[11].mxu0 }
 0x15f   :  { %v1420_v26 = vpop.f32.mrb[11].mxu1  ;;  %v1042_v27 = vadd.f32 %v1396_v20, %v1002_v16 }
 0x161   :  { %v1082_v28 = vadd.f32 %v1418_v23, %v1042_v27 }
 0x163   :  { %v1087_v29 = vmax.f32 %v1082_v28, 0.0 }
 0x165   :  { %1088 = vxpose.xlu0.b32.start.end [1/1] (short) %v1087_v29, 128 }
 0x18e   :  { %1459 = vset.pattern.permute.xlu0 %v1634_v31 }
 0x1ca   :  { %1132 = vperm.xlu0 %1459, %v1129_v32  }
 0x1e5   :  { %v1104_v33 = vpop.trf.xlu0 }
 0x1e9   :  { %v1105_v34 = vpop.trf.xlu0 }
 0x1ea   :  { %v1120_v35 = vpack.c.bf16 %v1105_v34, %v1104_v33 }
 0x1ec   :  { %1432 = vmatpush3.bf16.msra.mxu0 %v1120_v35 }
 0x1ed   :  { %v1106_v36 = vpop.trf.xlu0  ;;  %1433 = vmatprep.subr.bf16.mxu0 %v1632_v30 }
 0x1f1   :  { %v1107_v37 = vpop.trf.xlu0 }
 0x1f2   :  { %v1121_v38 = vpack.c.bf16 %v1107_v37, %v1106_v36 }
 0x1f4   :  { %1434 = vmatpush3.bf16.msra.mxu0 %v1121_v38 }
 0x1f5   :  { %v1108_v39 = vpop.trf.xlu0  ;;  %1435 = vmatprep.subr.bf16.mxu0 %v1632_v30 }
 0x1f9   :  { %v1109_v40 = vpop.trf.xlu0 }
 0x1fa   :  { %v1122_v41 = vpack.c.bf16 %v1109_v40, %v1108_v39 }
 0x1fc   :  { %1436 = vmatpush3.bf16.msra.mxu0 %v1122_v41 }
 0x1fd   :  { %v1110_v42 = vpop.trf.xlu0  ;;  %1437 = vmatprep.subr.bf16.mxu0 %v1632_v30 }
 0x201   :  { %v1111_v43 = vpop.trf.xlu0 }
 0x202   :  { %v1123_v44 = vpack.c.bf16 %v1111_v43, %v1110_v42 }
 0x204   :  { %1438 = vmatpush3.bf16.msra.mxu0 %v1123_v44 }
 0x205   :  { %v1112_v45 = vpop.trf.xlu0  ;;  %1439 = vmatprep.subr.bf16.mxu0 %v1632_v30 }
 0x209   :  { %v1113_v46 = vpop.trf.xlu0 }
 0x20a   :  { %v1124_v47 = vpack.c.bf16 %v1113_v46, %v1112_v45 }
 0x20c   :  { %1440 = vmatpush3.bf16.msra.mxu0 %v1124_v47 }
 0x20d   :  { %v1114_v48 = vpop.trf.xlu0  ;;  %1441 = vmatprep.subr.bf16.mxu0 %v1632_v30 }
 0x211   :  { %v1115_v49 = vpop.trf.xlu0 }
 0x212   :  { %v1125_v50 = vpack.c.bf16 %v1115_v49, %v1114_v48 }
 0x214   :  { %1442 = vmatpush3.bf16.msra.mxu0 %v1125_v50 }
 0x215   :  { %v1116_v51 = vpop.trf.xlu0  ;;  %1443 = vmatprep.subr.bf16.mxu0 %v1632_v30 }
 0x219   :  { %v1117_v52 = vpop.trf.xlu0 }
 0x21a   :  { %v1126_v53 = vpack.c.bf16 %v1117_v52, %v1116_v51 }
 0x21c   :  { %1444 = vmatpush3.bf16.msra.mxu0 %v1126_v53 }
 0x21d   :  { %v1118_v54 = vpop.trf.xlu0  ;;  %1445 = vmatprep.subr.bf16.mxu0 %v1632_v30 }
 0x221   :  { %v1119_v55 = vpop.trf.xlu0 }
 0x222   :  { %v1127_v56 = vpack.c.bf16 %v1119_v55, %v1118_v54 }
 0x224   :  { %1446 = vmatpush3.bf16.msra.mxu0 %v1127_v56 }
 0x227   :  { %1448 = vmatmul.mubr.bf16.vlgmr.msra.gmra.mrb[12].mxu0 %v1128_v57 }
 0x249   :  { %v1133_v58 = vpop.permute.xlu0 %1132 }
 0x2fa   :  { %v1169_v59 = vpop.f32.mrb[12].mxu0 }
 0x2fb   :  { %v1170_v60 = vadd.f32 %v1169_v59, %v1133_v58  ;;  %v1449_v61 = vpop.f32.mrb[13].mxu0 }
 0x2fc   :  { %v1172_v62 = vpop.f32.mrb[14].mxu0 }
 0x2fd   :  { %v1450_v63 = vpop.f32.mrb[15].mxu0  ;;  %1176 = vst.msk [vmem:[#allocation7] sm:$0xff] %vm1175_vm1, %v1170_v60 }
 0x2fe   :  { %1611 = shalt.err (!%p1608_p6)
}
 0x2ff   :  { %s1612_s25 = scalar_lea.hbm %s1723_s5, 128 }
 0x300   :  { %p1613_p7 = scmp.ne.s32.totalorder %s1723_s5, %s1612_s25  ;;  %p1616_p8 = scmp.lt.u32.totalorder %s1612_s25, %s1723_s5 }
 0x302   :  { %p1618_p9 = pnand %p1616_p8, %p1613_p7 }
 0x304   :  { %1621 = shalt.err (!%p1618_p9)
}
 0x305   :  { %1186 = dma.vmem_to_hbm [thread:$0]  %s1184_s22, 128, %s1723_s5, [#allocation4]  }
 0x306   :  { %1626 = dma.done.wait [#allocation4], 128  }
 0x307   :  { %1627 = vsyncadd [#allocation4], 4294967168 }
 0x308   :  { %1190 = vsyncpa [#allocation3], 1 }
 0x309   :  { %1191 = vsyncpa [#allocation6], 1 }
 0x30a   :  { %1192 = vsyncpa [#allocation4], 1 }

</bundles_post_ra>
